<compile_context>
chip_gen: v7x
topology: tpu7x:2x2x1
jax: 0.10.0
libtpu: 0.0.40
codegen_flags: <defaults>
</compile_context>

<pallas_src>
import jax
import jax.numpy as jnp
from jax.experimental import pallas as pl
from jax.experimental.pallas import tpu as pltpu


def _round_up(x: int, m: int) -> int:
    return (x + m - 1) // m * m


def _embed_kernel(xp_ref, w_ref, posb_ref, o_ref):
    # xp_ref  : (tm, Kp)  patch rows for one (row-tile, batch), compute dtype
    # w_ref   : (Kp, D)   flattened conv weight, compute dtype (grid-invariant)
    # posb_ref: (tm, D)   positional embedding + folded conv bias, compute dtype
    # o_ref   : (tm, D)   output tile
    y = jnp.dot(xp_ref[...], w_ref[...], preferred_element_type=jnp.float32)
    o_ref[...] = (y + posb_ref[...].astype(jnp.float32)).astype(o_ref.dtype)


def _pick_tile_m(n_rows, kp, d, in_bytes, out_bytes, batch, vmem_budget):
    """Largest row tile (multiple of 16) whose pipelined footprint fits the
    VMEM budget, shrunk if needed so the parallel grid has >= 2 steps
    (v7x has two TensorCores)."""
    def footprint(tm):
        return (2 * tm * kp * in_bytes       # double-buffered activations
                + 2 * tm * d * in_bytes      # double-buffered posb
                + 2 * tm * d * out_bytes     # double-buffered output
                + 2 * kp * d * in_bytes)     # weight (grid-invariant)

    tm = _round_up(n_rows, 16)
    while footprint(tm) > vmem_budget and tm > 16:
        tm = max(16, _round_up(tm // 2, 16))
    if batch * ((n_rows + tm - 1) // tm) < 2 and tm > 16:
        tm = max(16, _round_up((n_rows + 1) // 2, 16))
    return tm


def siglip_vision_embeddings(x, conv_w, conv_b, pos_emb, patch_size, *,
                             compute_dtype=jnp.bfloat16, out_dtype=None,
                             tile_m=None):
    """SiglipVisionEmbeddings.forward.

    x: (B, C, H, W) NCHW; conv_w: (D, C, P, P) OIHW; conv_b: (D,);
    pos_emb: (N, D) with N = (H // P) * (W // P).  Returns (B, N, D).
    """
    B, C, H, W = x.shape
    D = conv_w.shape[0]
    P = patch_size
    assert H % P == 0 and W % P == 0, "image size must be divisible by patch size"
    Gh, Gw = H // P, W // P
    N = Gh * Gw
    K = C * P * P
    Kp = _round_up(K, 128)                       # lane-dense contraction dim
    out_dtype = x.dtype if out_dtype is None else out_dtype

    in_bytes = jnp.dtype(compute_dtype).itemsize
    out_bytes = jnp.dtype(out_dtype).itemsize
    vmem_budget = 30 * 1024 * 1024               # headroom on v7x (64 MiB VMEM)
    if tile_m is None:
        tm = _pick_tile_m(N, Kp, D, in_bytes, out_bytes, B, vmem_budget)
    else:
        tm = min(_round_up(tile_m, 16), _round_up(N, 16))
    num_row_tiles = (N + tm - 1) // tm

    # --- patchify: one fused cast+transpose(+K-pad) pass over the image ----
    # (c, ph, pw) flatten order matches the OIHW weight reshape below.
    # TODO(synk): fuse this pass into the kernel (see header comment).
    xp = x.astype(compute_dtype).reshape(B, C, Gh, P, Gw, P)
    xp = jnp.transpose(xp, (0, 2, 4, 1, 3, 5)).reshape(B, N, K)
    if Kp != K:
        # Zero K-padding is required for correctness: the row dim is read
        # raggedly, so garbage must never enter the contraction.
        xp = jnp.pad(xp, ((0, 0), (0, 0), (0, Kp - K)))

    w_flat = conv_w.reshape(D, K).T.astype(compute_dtype)          # (K, D)
    if Kp != K:
        w_flat = jnp.pad(w_flat, ((0, Kp - K), (0, 0)))

    # Conv bias folded into the positional table (one fewer input stream).
    posb = (pos_emb.astype(jnp.float32)
            + conv_b.astype(jnp.float32)[None, :]).astype(compute_dtype)

    grid = (num_row_tiles, B)                    # batch fastest-varying

    out = pl.pallas_call(
        _embed_kernel,
        out_shape=jax.ShapeDtypeStruct((B, N, D), out_dtype),
        grid_spec=pltpu.PrefetchScalarGridSpec(
            num_scalar_prefetch=0,
            grid=grid,
            in_specs=[
                # Activations: new block every step; leading batch dim squeezed.
                pl.BlockSpec((None, tm, Kp), lambda n, b: (b, n, 0)),
                # Weight: grid-invariant block, DMA'd once.
                pl.BlockSpec((Kp, D), lambda n, b: (0, 0)),
                # posb: constant across the inner batch loop -> re-DMA skipped.
                pl.BlockSpec((tm, D), lambda n, b: (n, 0)),
            ],
            out_specs=pl.BlockSpec((None, tm, D), lambda n, b: (b, n, 0)),
        ),
        compiler_params=pltpu.CompilerParams(
            dimension_semantics=("parallel", "parallel"),
            # Above v5e's 16 MiB scoped default, safely under v7x's 64 MiB
            # physical VMEM; the tile picker keeps the footprint <= 30 MiB.
            vmem_limit_bytes=48 * 1024 * 1024,
        ),
    )(xp, w_flat, posb)
    return out


def reference(x, conv_w, conv_b, pos_emb, patch_size):
    """Pure-JAX reference mirroring the PyTorch forward."""
    y = jax.lax.conv_general_dilated(
        x.astype(jnp.float32), conv_w.astype(jnp.float32),
        window_strides=(patch_size, patch_size), padding="VALID",
        dimension_numbers=("NCHW", "OIHW", "NCHW"))
    y = y + conv_b.reshape(1, -1, 1, 1)
    B, D = y.shape[0], y.shape[1]
    y = y.reshape(B, D, -1)              # flatten(start_dim=2)
    y = jnp.transpose(y, (0, 2, 1))      # (B, N, D)
    return y + pos_emb[None, :, :]       # positional_embeddings(position_ids)


if __name__ == "__main__":
    # Small config consistent with the module:
    #   image_size=16, patch_size=4 -> num_patches=16, num_channels=4.
    #   hidden_size=128 keeps the embedding (lane) dim a multiple of 128, as
    #   in real SigLIP configs (768 / 1152), so output stores are lane-dense.
    B, C, IMG, P, D = 2, 4, 16, 4, 128
    N = (IMG // P) ** 2

    key = jax.random.PRNGKey(0)
    k_x, k_w, k_b, k_pos = jax.random.split(key, 4)
    x = jax.random.normal(k_x, (B, C, IMG, IMG), dtype=jnp.float32)
    conv_w = jax.random.normal(k_w, (D, C, P, P), dtype=jnp.float32) * 0.05
    conv_b = jax.random.normal(k_b, (D,), dtype=jnp.float32) * 0.05
    pos_emb = jax.random.normal(k_pos, (N, D), dtype=jnp.float32) * 0.02

    ref = reference(x, conv_w, conv_b, pos_emb, P)

    # f32 compute + f32 output: tight check against the conv reference.
    out_f32 = siglip_vision_embeddings(x, conv_w, conv_b, pos_emb, P,
                                       compute_dtype=jnp.float32)
    out_f32 = jax.block_until_ready(out_f32)
    assert out_f32.shape == (B, N, D), out_f32.shape
    assert jnp.allclose(out_f32, ref, atol=1e-4, rtol=1e-4), "f32 path mismatch"

    # Fast path: bf16 operands, bf16 posb, bf16 output (looser tolerance).
    out_bf16 = siglip_vision_embeddings(x, conv_w, conv_b, pos_emb, P,
                                        out_dtype=jnp.bfloat16)
    out_bf16 = jax.block_until_ready(out_bf16)
    assert out_bf16.shape == (B, N, D), out_bf16.shape
    assert out_bf16.dtype == jnp.bfloat16, out_bf16.dtype
    assert jnp.allclose(out_bf16.astype(jnp.float32), ref,
                        atol=5e-2, rtol=5e-2), "bf16 path mismatch"

    print("KERNEL_OK")
</pallas_src>

<mosaic_0001>
module attributes {stable_mosaic.version = 11 : i64} {
  func.func @_embed_kernel(%arg0: i32, %arg1: i32, %arg2: memref<1x16x128xf32, #tpu.memory_space<vmem>>, %arg3: memref<128x128xf32, #tpu.memory_space<vmem>>, %arg4: memref<16x128xf32, #tpu.memory_space<vmem>>, %arg5: memref<1x16x128xf32, #tpu.memory_space<vmem>>) attributes {dimension_semantics = [#tpu.dimension_semantics<parallel>, #tpu.dimension_semantics<parallel>], iteration_bounds = array<i64: 1, 2>, scalar_prefetch = 0 : i64, scratch_operands = 0 : i64, tpu.core_type = #tpu.core_type<tc>, window_params = [{transform_indices = @transform_0, window_bounds = array<i64: 1, 16, 128>}, {pipeline_mode = #tpu.pipeline_mode<synchronous>, transform_indices = @transform_1, window_bounds = array<i64: 128, 128>}, {transform_indices = @transform_2, window_bounds = array<i64: 16, 128>}, {transform_indices = @transform_3, window_bounds = array<i64: 1, 16, 128>}]} {
    %c0 = arith.constant 0 : index
    %c0_0 = arith.constant 0 : index
    %c0_1 = arith.constant 0 : index
    %0 = vector.load %arg2[%c0, %c0_0, %c0_1] : memref<1x16x128xf32, #tpu.memory_space<vmem>>, vector<1x16x128xf32>
    %1 = vector.shape_cast %0 : vector<1x16x128xf32> to vector<16x128xf32>
    %c0_2 = arith.constant 0 : index
    %c0_3 = arith.constant 0 : index
    %2 = vector.load %arg3[%c0_2, %c0_3] : memref<128x128xf32, #tpu.memory_space<vmem>>, vector<128x128xf32>
    %cst = arith.constant dense<0.000000e+00> : vector<16x128xf32>
    %3 = tpu.matmul %1, %2, %cst {dimension_numbers = #tpu.dot_dimension_numbers<[1], [0], [0], [1], [0, 0, 1, 1], [], []>} : vector<16x128xf32>, vector<128x128xf32>, vector<16x128xf32> -> vector<16x128xf32>
    %c0_4 = arith.constant 0 : index
    %c0_5 = arith.constant 0 : index
    %4 = vector.load %arg4[%c0_4, %c0_5] : memref<16x128xf32, #tpu.memory_space<vmem>>, vector<16x128xf32>
    %5 = arith.addf %3, %4 : vector<16x128xf32>
    %c0_6 = arith.constant 0 : index
    %c0_7 = arith.constant 0 : index
    %c0_8 = arith.constant 0 : index
    %6 = vector.load %arg5[%c0_6, %c0_7, %c0_8] : memref<1x16x128xf32, #tpu.memory_space<vmem>>, vector<1x16x128xf32>
    %7 = vector.shape_cast %6 : vector<1x16x128xf32> to vector<16x128xf32>
    %8 = vector.shape_cast %5 : vector<16x128xf32> to vector<1x16x128xf32>
    tpu.vector_store %arg5[%c0_6, %c0_7, %c0_8], %8 {strides = array<i32>} : memref<1x16x128xf32, #tpu.memory_space<vmem>>, vector<1x16x128xf32>,
    return
  }
  func.func @transform_0(%arg0: i32, %arg1: i32) -> (i32, i32, i32) {
    %c0_i32 = arith.constant 0 : i32
    %c0_i32_0 = arith.constant 0 : i32
    return %arg1, %arg0, %c0_i32 : i32, i32, i32
  }
  func.func @transform_1(%arg0: i32, %arg1: i32) -> (i32, i32) {
    %c0_i32 = arith.constant 0 : i32
    %c0_i32_0 = arith.constant 0 : i32
    %c0_i32_1 = arith.constant 0 : i32
    return %c0_i32, %c0_i32_0 : i32, i32
  }
  func.func @transform_2(%arg0: i32, %arg1: i32) -> (i32, i32) {
    %c0_i32 = arith.constant 0 : i32
    %c0_i32_0 = arith.constant 0 : i32
    return %arg0, %c0_i32 : i32, i32
  }
  func.func @transform_3(%arg0: i32, %arg1: i32) -> (i32, i32, i32) {
    %c0_i32 = arith.constant 0 : i32
    %c0_i32_0 = arith.constant 0 : i32
    return %arg1, %arg0, %c0_i32 : i32, i32, i32
  }
}

</mosaic_0001>

<bundles_post_ra>
// kernel: tpu_custom_call.1
= control target key start
LH: loop header
LB: loop body
LE: loop exit
PB: predicated region body
PF: predicated region fallthrough
CT: control target
= control target key end

     0   :  { %8 = vsyncpa [#allocation3], 0  ;;  %s1135_s0 = inlined_call_operand.hbm [shape: f32[2,16,128], index: 0, kind: input, shape index: {}]   ;;  %s1136_s1 = inlined_call_operand.hbm [shape: f32[128,128], index: 1, kind: input, shape index: {}]   ;;  %s1137_s2 = inlined_call_operand.hbm [shape: f32[16,128], index: 2, kind: input, shape index: {}]   ;;  %s1138_s3 = inlined_call_operand.hbm [shape: f32[2,16,128], index: 3, kind: output, shape index: {}]  }
   0x1   :  { %10 = vsyncpa [#allocation3 + $0x1], 0 }
   0x2   :  { %11 = vsyncpa [#allocation6], 0 }
   0x3   :  { %12 = vsyncpa [#allocation4], 0 }
   0x4   :  { %14 = vsyncpa [#allocation4 + $0x1], 0  ;;  %s863_s12 = smov 0   ;;  %s865_s13 = smov 0  }
   0x5   :  { %s867_s14 = smov 0   ;;  %s869_s15 = smov 0  }
   0x6   :  { %s871_s16 = smov 0   ;;  %s873_s17 = smov 0  }
   0x7 LB: > { %s468_s18 = sadd.s32 4294967295, %s833_s17   ;;  %s469_s19 = sadd.s32 4294967294, %s833_s17   ;;  %s833_s17 = sphi %s873_s17, %s20_s17   ;;  %s829_s16 = sphi %s871_s16, %s1160_s16   ;;  %s825_s15 = sphi %s869_s15, %s1159_s15   ;;  %s821_s14 = sphi %s867_s14, %s1158_s14   ;;  %s817_s13 = sphi %s865_s13, %s1157_s13   ;;  %s813_s12 = sphi %s863_s12, %s1156_s12  }
   0x8   : > { %p54_p0 = scmp.ne.s32.totalorder %s817_s13, %s813_s12  ;;  %p897_p1 = scmp.eq.s32.totalorder %s468_s18, 0 }
   0x9   : > { %p901_p2 = scmp.eq.s32.totalorder %s468_s18, 1  ;;  %p133_p3 = scmp.eq.s32.totalorder %s469_s19, 1 }
   0xa   : > { %s1143_s20 = scalar_select %p897_p1, 1, 0 }
   0xb   : > { %p907_p4 = por %p897_p1, %p54_p0  ;;  %p470_p5 = scmp.ge.s32.totalorder %s833_s17, 1 }
   0xc   : > { %p912_p6 = por %p133_p3, %p54_p0  ;;  %p140_p7 = scmp.lt.s32.totalorder %s833_s17, 3 }
   0xd   : > { %s1145_s22 = scalar_select %p907_p4, 1, 0 }
   0xe   : > { %s1146_s23 = scalar_select %p912_p6, 1, 0 }
   0xf   : > { %p917_p8 = pnand %p470_p5, %p140_p7  ;;  %s835_s25 = smov [#allocation5]  }
  0x10   : > { %s152_s26 = sshll.u32 %s835_s25, 4  ;;  %s836_s28 = smov [#allocation7]   ;;  %s921_s26 = int_to_ptr.vmem [resolvable:$true] %s152_s26 }
  0x11   : > { %p586_p9 = pneg %p917_p8  ;;  %s168_s29 = sshll.u32 %s836_s28, 4  ;;  %s932_s29 = int_to_ptr.vmem [resolvable:$true] %s168_s29 }
  0x12   : > { %s661_s5 = scalar_lea.hbm %s1136_s1, 2048 }
  0x13   : > { %p928_p11 = pnand %p586_p9, %p897_p1  ;;  %p662_p12 = scmp.ne.s32.totalorder %s1136_s1, %s661_s5 }
  0x14   : > { %p668_p5 = scmp.lt.u32.totalorder %s661_s5, %s1136_s1 }
  0x15   : > { %p663_p13 = pneg %p928_p11 }
  0x17   : > { %p664_p0 = pnand %p663_p13, %p662_p12 }
  0x19   : > { %p665_p3 = pneg %p664_p0 }
  0x1b   : > { %p670_p7 = pnand %p668_p5, %p665_p3 }
  0x1d   : > { %673 = shalt.err (!%p670_p7)
}
  0x1e   : > { %s674_s10 = scalar_lea.vmem %s921_s26, 2048  ;;  %p682_p1 = scmp.lt.s32.totalorder %s921_s26, %s921_s26 }
  0x1f   : > { %p675_p9 = scmp.ne.s32.totalorder %s921_s26, %s674_s10  ;;  %p683_p12 = scmp.lt.s32.totalorder %s674_s10, %s674_s10 }
  0x21   : > { %p677_p10 = pnand %p675_p9, %p663_p13  ;;  %p684_p0 = por %p683_p12, %p682_p1 }
  0x23   : > { %p678_p6 = pneg %p677_p10 }
  0x25   : > { %p685_p4 = pnand %p684_p0, %p678_p6 }
  0x27   : > { %688 = shalt.err (!%p685_p4)
}
  0x28   : > { %s837_s11 = smov 128   ;;  %s838_s18 = smov 8  }
  0x29   : > { %589 = dma.hbm_to_vmem [thread:$0]  (!%p928_p11), %s1136_s1, 2048, %s921_s26, [#allocation6], %s837_s11, %s837_s11, %s838_s18  }
  0x2a   : > { %s689_s4 = scalar_lea.hbm %s1137_s2, 256 }
  0x2b   : > { %p690_p1 = scmp.ne.s32.totalorder %s1137_s2, %s689_s4  ;;  %p696_p10 = scmp.lt.u32.totalorder %s689_s4, %s1137_s2 }
  0x2d   : > { %p692_p4 = pnand %p690_p1, %p663_p13 }
  0x2f   : > { %p693_p6 = pneg %p692_p4 }
  0x31   : > { %p698_p3 = pnand %p696_p10, %p693_p6 }
  0x33   : > { %701 = shalt.err (!%p698_p3)
}
  0x34   : > { %s702_s26 = scalar_lea.vmem %s932_s29, 256  ;;  %p710_p12 = scmp.lt.s32.totalorder %s932_s29, %s932_s29 }
  0x35   : > { %p703_p5 = scmp.ne.s32.totalorder %s932_s29, %s702_s26  ;;  %p711_p0 = scmp.lt.s32.totalorder %s702_s26, %s702_s26 }
  0x37   : > { %p705_p7 = pnand %p703_p5, %p663_p13  ;;  %p712_p1 = por %p711_p0, %p710_p12 }
  0x39   : > { %p706_p9 = pneg %p705_p7 }
  0x3b   : > { %p713_p4 = pnand %p712_p1, %p706_p9 }
  0x3d   : > { %716 = shalt.err (!%p713_p4)
}
  0x3e   : > { %592 = dma.hbm_to_vmem [thread:$0]  (!%p928_p11), %s1137_s2, 256, %s932_s29, [#allocation6], %s837_s11, %s837_s11, %s838_s18  }
  0x3f   : > { %s29_s27 = sadd.s32 1, %s829_s16  ;;  %s41_s19 = sadd.s32 1, %s821_s14 }
  0x40   : > { %p30_p13 = scmp.ge.s32.totalorder %s29_s27, 2  ;;  %p48_p6 = scmp.ne.s32.totalorder %s821_s14, %s817_s13 }
  0x41   : > { %p49_p10 = scmp.eq.s32.totalorder %s833_s17, 0  ;;  %p603_p3 = scmp.lt.s32.totalorder %s833_s17, 2 }
  0x42   : > { %s1162_s27 = smov (%p30_p13, %s29_s27), 0  ;;  %p1002_p7 = por %p901_p2, %p48_p6 }
  0x43   : > { %p50_p5 = por %p49_p10, %p48_p6  ;;  %s36_s28 = ssub.s32 %s829_s16, %s1162_s27 }
  0x44   : > { %s1149_s25 = scalar_select %p1002_p7, 1, 0 }
  0x45   : > { %s182_s30 = sand.u32 1, %s821_s14   ;;  %p39_p9 = scmp.eq.s32.totalorder %s36_s28, 0 }
  0x46   : > { %s474_s29 = sshll.u32 %s182_s30, 4  ;;  %s487_s4 = sshll.u32 %s829_s16, 8 }
  0x47   : > { %s1011_s5 = scalar_select %p39_p9, %s821_s14, %s41_s19  }
  0x48   : > { %s1016_s8 = scalar_lea.hbm %s1135_s0, %s487_s4  ;;  %s186_s21 = scalar_lea.vmem [#allocation2], %s474_s29 }
  0x49   : > { %s195_s26 = sshll.u32 %s186_s21, 4  ;;  %p1020_p2 = pnand %p603_p3, %p50_p5  ;;  %s1024_s26 = int_to_ptr.vmem [resolvable:$true] %s195_s26 }
  0x4a   : > { %s1026_s10 = scalar_lea.sflag [#allocation3], %s182_s30  ;;  %s717_s19 = scalar_lea.hbm %s1016_s8, 256 }
  0x4b   : > { %p718_p11 = scmp.ne.s32.totalorder %s1016_s8, %s717_s19  ;;  %p719_p12 = pneg %p1020_p2 }
  0x4c   : > { %s722_s4 = scalar_lea.hbm %s1135_s0, 512  ;;  %p723_p4 = scmp.lt.u32.totalorder %s1016_s8, %s1135_s0 }
  0x4d   : > { %p720_p0 = pnand %p719_p12, %p718_p11  ;;  %p724_p13 = scmp.lt.u32.totalorder %s722_s4, %s717_s19 }
  0x4e   : > { %p726_p10 = scmp.lt.u32.totalorder %s717_s19, %s1016_s8 }
  0x4f   : > { %p721_p1 = pneg %p720_p0  ;;  %p725_p6 = por %p724_p13, %p723_p4 }
  0x51   : > { %p727_p3 = por %p726_p10, %p725_p6 }
  0x53   : > { %p728_p5 = pnand %p727_p3, %p721_p1 }
  0x55   : > { %731 = shalt.err (!%p728_p5)
}
  0x56   : > { %s732_s30 = scalar_lea.vmem %s1024_s26, 256  ;;  %s839_s21 = smov [#allocation2]  }
  0x57   : > { %p733_p9 = scmp.ne.s32.totalorder %s1024_s26, %s732_s30  ;;  %s737_s28 = sshll.u32 %s839_s21, 4  ;;  %s738_s28 = int_to_ptr.vmem [resolvable:$false] %s737_s28 }
  0x58   : > { %s739_s29 = scalar_lea.vmem %s738_s28, 512  ;;  %p740_p7 = scmp.lt.s32.totalorder %s1024_s26, %s738_s28 }
  0x59   : > { %p735_p11 = pnand %p733_p9, %p719_p12  ;;  %p741_p4 = scmp.lt.s32.totalorder %s739_s29, %s732_s30 }
  0x5b   : > { %p736_p0 = pneg %p735_p11  ;;  %p742_p13 = por %p741_p4, %p740_p7 }
  0x5d   : > { %p743_p6 = pnand %p742_p13, %p736_p0 }
  0x5f   : > { %746 = shalt.err (!%p743_p6)
}
  0x60   : > { %596 = dma.hbm_to_vmem [thread:$0]  (!%p1020_p2), %s1016_s8, 256, %s1024_s26, %s1026_s10, %s837_s11, %s837_s11, %s838_s18  }
  0x61   : > { %207 = sbr.rel (%p917_p8) target bundleno = 373 (0x175), region = 32  ;;  %s1060_s19 = sand.u32 (!%p917_p8), 1, %s817_s13  }
  0x62   : > { %s478_s4 = sshll.u32 (!%p917_p8), %s1060_s19, 4  ;;  %s210_s6 = scalar_lea.sflag (!%p917_p8), [#allocation3], %s1060_s19 }
  0x63   : > { %s1066_s9 = scalar_lea.vmem (!%p917_p8), [#allocation2], %s478_s4  ;;  %p1151_p7 = scmp.ne.s32.totalorder (!%p917_p8), %s1145_s22, 0 }
  0x68   : > { %800 = dma.done.wait (%p1151_p7), %s210_s6, 256  }
  0x69   : > { %802 = vsyncadd (%p1151_p7), %s210_s6, 4294967040  ;;  %p1152_p2 = scmp.ne.s32.totalorder %s1143_s20, 0 }
  0x6b   : > { %804 = dma.done.wait (%p1152_p2), [#allocation6], 2304  }
  0x6c   : > { %806 = vsyncadd (%p1152_p2), [#allocation6], 4294964992  ;;  %v249_v0 = vld [vmem:[#allocation5] sm:$0xff]  ;;  %v250_v1 = vld [vmem:[#allocation5 + $0x8] sm:$0xff]  ;;  %s243_s20 = scalar_lea.vmem [#allocation8], %s478_s4  ;;  %s488_s24 = sshll.u32 %s825_s15, 8 }
  0x6d   : > { %v251_v2 = vld [vmem:[#allocation5 + $0x10] sm:$0xff]  ;;  %v542_v3 = vpack.c.bf16 %v250_v1, %v249_v0  ;;  %v252_v4 = vld [vmem:[#allocation5 + $0x18] sm:$0xff]  ;;  %v253_v6 = vld [vmem:[#allocation5 + $0x20] sm:$0xff]  ;;  %s360_s22 = sshll.u32 %s243_s20, 4  ;;  %s1086_s8 = scalar_lea.hbm %s1138_s3, %s488_s24  ;;  %s1081_s22 = int_to_ptr.vmem [resolvable:$true] %s360_s22 }
  0x6e   : > { %v546_v5 = vpack.c.bf16 %v252_v4, %v251_v2  ;;  %v254_v7 = vld [vmem:[#allocation5 + $0x28] sm:$0xff]  ;;  %v247_v9 = vld [vmem:[%s1066_s9] sm:$0xff]  ;;  %v256_v11 = vld [vmem:[#allocation5 + $0x38] sm:$0xff]  ;;  %s345_s26 = scalar_lea.sflag [#allocation4], %s1060_s19  ;;  %s747_s10 = scalar_lea.vmem %s1081_s22, 256 }
  0x6f   : > { %543 = vmatprep.subr.bf16.mxu0 %v542_v3  ;;  %v550_v8 = vpack.c.bf16 %v254_v7, %v253_v6  ;;  %v255_v10 = vld [vmem:[#allocation5 + $0x30] sm:$0xff]  ;;  %539 = vmatprep.mubr.f32.mxu0 %v247_v9  ;;  %v257_v13 = vld [vmem:[#allocation5 + $0x40] sm:$0xff]  ;;  %v258_v14 = vld [vmem:[#allocation5 + $0x48] sm:$0xff]  ;;  %p748_p8 = scmp.ne.s32.totalorder %s1081_s22, %s747_s10  ;;  %p1153_p12 = scmp.ne.s32.totalorder %s1149_s25, 0 }
  0x70   : > { %545 = vmatpush3.bf16.msra.mxu0 %v542_v3  ;;  %v554_v12 = vpack.c.bf16 %v256_v11, %v255_v10  ;;  %v558_v15 = vpack.c.bf16 %v258_v14, %v257_v13  ;;  %v259_v16 = vld [vmem:[#allocation5 + $0x50] sm:$0xff]  ;;  %v260_v17 = vld [vmem:[#allocation5 + $0x58] sm:$0xff]  ;;  %v261_v19 = vld [vmem:[#allocation5 + $0x60] sm:$0xff]  ;;  %s840_s15 = smov [#allocation8]  }
  0x71   : > { %547 = vmatprep.subr.bf16.mxu0 %v546_v5  ;;  %v562_v18 = vpack.c.bf16 %v260_v17, %v259_v16  ;;  %v262_v20 = vld [vmem:[#allocation5 + $0x68] sm:$0xff]  ;;  %v263_v22 = vld [vmem:[#allocation5 + $0x70] sm:$0xff]  ;;  %v264_v23 = vld [vmem:[#allocation5 + $0x78] sm:$0xff]  ;;  %p749_p1 = pnand %p748_p8, %p1153_p12  ;;  %s751_s7 = sshll.u32 %s840_s15, 4  ;;  %s752_s7 = int_to_ptr.vmem [resolvable:$false] %s751_s7 }
  0x72   : > { %v566_v21 = vpack.c.bf16 %v262_v20, %v261_v19  ;;  %v570_v24 = vpack.c.bf16 %v264_v23, %v263_v22  ;;  %v248_v25 = vld [vmem:[%s1066_s9 + $0x8] sm:$0xff]  ;;  %v265_v27 = vld [vmem:[#allocation7] sm:$0xff]  ;;  %s753_s30 = scalar_lea.vmem %s752_s7, 512  ;;  %p754_p3 = scmp.lt.s32.totalorder %s1081_s22, %s752_s7 }
  0x73   : > { %v266_v26 = vld [vmem:[#allocation7 + $0x8] sm:$0xff]  ;;  %p750_p10 = pneg %p749_p1  ;;  %p755_p5 = scmp.lt.s32.totalorder %s753_s30, %s747_s10 }
  0x74   : > { %549 = vmatpush3.bf16.msra.mxu0 %v546_v5 }
  0x75   : > { %551 = vmatprep.subr.bf16.mxu0 %v550_v8  ;;  %p756_p9 = por %p755_p5, %p754_p3 }
  0x77   : > { %p757_p11 = pnand %p756_p9, %p750_p10 }
  0x78   : > { %553 = vmatpush3.bf16.msra.mxu0 %v550_v8 }
  0x79   : > { %555 = vmatprep.subr.bf16.mxu0 %v554_v12 }
  0x7c   : > { %557 = vmatpush3.bf16.msra.mxu0 %v554_v12 }
  0x7d   : > { %559 = vmatprep.subr.bf16.mxu0 %v558_v15 }
  0x80   : > { %561 = vmatpush3.bf16.msra.mxu0 %v558_v15 }
  0x81   : > { %563 = vmatprep.subr.bf16.mxu0 %v562_v18 }
  0x84   : > { %565 = vmatpush3.bf16.msra.mxu0 %v562_v18 }
  0x85   : > { %567 = vmatprep.subr.bf16.mxu0 %v566_v21 }
  0x88   : > { %569 = vmatpush3.bf16.msra.mxu0 %v566_v21 }
  0x89   : > { %571 = vmatprep.subr.bf16.mxu0 %v570_v24 }
  0x8c   : > { %573 = vmatpush3.bf16.msra.mxu0 %v570_v24 }
  0x8f   : > { %540 = vmatmul.mubr.f32.vlgmr.msra.gmra.mrb[0].mxu0 %v248_v25 }
 0x162   : > { %v541_v28 = vpop.f32.mrb[0].mxu0 }
 0x163   : > { %v339_v29 = vadd.f32 %v541_v28, %v266_v26  ;;  %v333_v30 = vpop.f32.mrb[1].mxu0 }
 0x164   : > { %v334_v31 = vadd.f32 %v333_v30, %v265_v27 }
 0x165   : > { %343 = vst [vmem:[%s243_s20 + $0x8] sm:$0xff] %v339_v29 }
 0x166   : > { %342 = vst [vmem:[%s243_s20] sm:$0xff] %v334_v31 }
 0x167   : > { %760 = shalt.err (!%p757_p11)
}
 0x168   : > { %s761_s21 = scalar_lea.hbm %s1086_s8, 256  ;;  %s765_s4 = scalar_lea.hbm %s1138_s3, 512 }
 0x169   : > { %p762_p0 = scmp.ne.s32.totalorder %s1086_s8, %s761_s21  ;;  %p766_p6 = scmp.lt.u32.totalorder %s1086_s8, %s1138_s3 }
 0x16a   : > { %p767_p7 = scmp.lt.u32.totalorder %s765_s4, %s761_s21  ;;  %p769_p8 = scmp.lt.u32.totalorder %s761_s21, %s1086_s8 }
 0x16b   : > { %p763_p4 = pnand %p762_p0, %p1153_p12 }
 0x16c   : > { %p768_p2 = por %p767_p7, %p766_p6 }
 0x16d   : > { %p764_p13 = pneg %p763_p4 }
 0x16e   : > { %p770_p1 = por %p769_p8, %p768_p2 }
 0x170   : > { %p771_p10 = pnand %p770_p1, %p764_p13 }
 0x172   : > { %774 = shalt.err (!%p771_p10)
}
 0x173   : > { %s841_s20 = smov 128   ;;  %s842_s24 = smov 8  }
 0x174   : > { %584 = dma.vmem_to_hbm [thread:$0]  (%p1153_p12), %s1081_s22, 256, %s1086_s8, %s345_s26, %s841_s20, %s841_s20, %s842_s24  }
 0x175 PF: > { %s375_s11 = sand.u32 1, %s813_s12   ;;  %p1154_p3 = scmp.ne.s32.totalorder %s1146_s23, 0 }
 0x176   : > { %p1155_p5 = scmp.ge.s32.totalorder %s833_s17, 2  ;;  %s376_s18 = scalar_lea.sflag [#allocation4], %s375_s11 }
 0x178   : > { %p598_p9 = pnand %p1155_p5, %p1154_p3 }
 0x17a   : > { %808 = dma.done.wait (!%p598_p9), %s376_s18, 256  }
 0x17b   : > { %810 = vsyncadd (!%p598_p9), %s376_s18, 4294967040  ;;  %s20_s17 = sadd.s32 1, %s833_s17   ;;  %s1156_s12 = smov %s817_s13 }
 0x17c   : > { %p17_p11 = scmp.ge.s32.totalorder %s20_s17, 4   ;;  %s1157_s13 = smov %s821_s14 }
 0x17d   : > { %s1158_s14 = smov %s1011_s5  ;;  %s1159_s15 = smov %s829_s16 }
 0x17e   : > { %s1160_s16 = smov %s1162_s27  ;;  %19 = sbr.rel (!%p17_p11) target bundleno = 7 (0x7), region = 86 }
 0x185   :  { %381 = vsyncpa [#allocation3], 1 }
 0x186   :  { %383 = vsyncpa [#allocation3 + $0x1], 1 }
 0x187   :  { %384 = vsyncpa [#allocation6], 1 }
 0x188   :  { %385 = vsyncpa [#allocation4], 1 }
 0x189   :  { %387 = vsyncpa [#allocation4 + $0x1], 1 }

</bundles_post_ra>
